<compile_context>
chip_gen: v7x
topology: tpu7x:2x2x1
jax: 0.10.0
libtpu: 0.0.40
codegen_flags: <defaults>
</compile_context>

<pallas_src>
import functools

import jax
import jax.numpy as jnp
from jax.experimental import pallas as pl
from jax.experimental.pallas import tpu as pltpu


def _round_up(x, m):
    return ((x + m - 1) // m) * m


def _fused_mlp_kernel(*refs, num_layers, negative_slope):
    """One batch tile through the whole MLP.

    refs = (x_ref, w0, b0, w1, b1, ..., w_{L-1}, b_{L-1}, o_ref)
    Hidden layers: y = LeakyReLU(x @ W + b); last layer: Identity.
    """
    x_ref = refs[0]
    o_ref = refs[-1]
    h = x_ref[...]                                       # (bm, d0_pad) f32
    for i in range(num_layers):                          # static unroll
        w = refs[1 + 2 * i][...]                         # (din_pad, dout_pad)
        b = refs[2 + 2 * i][...]                         # (1, dout_pad) f32
        y = jnp.dot(h.astype(w.dtype), w,
                    preferred_element_type=jnp.float32)  # MXU, f32 accumulate
        y = y + b                                        # bias broadcast
        if i != num_layers - 1:
            # LeakyReLU as a single vmax (exact for 0 <= slope <= 1).
            y = jnp.maximum(y, negative_slope * y)
        h = y
    o_ref[...] = h.astype(o_ref.dtype)


def init_vec_decoder_params(key, input_dim, nfs, out_dim, dtype=jnp.float32):
    """nn.Linear-style init; weights stored as (D_in, D_out) so y = x @ W + b."""
    dims = [input_dim, *nfs, out_dim]
    params = []
    for d_in, d_out in zip(dims[:-1], dims[1:]):
        key, kw, kb = jax.random.split(key, 3)
        bound = 1.0 / (d_in ** 0.5)
        w = jax.random.uniform(kw, (d_in, d_out), dtype, -bound, bound)
        b = jax.random.uniform(kb, (1, d_out), dtype, -bound, bound)
        params.append((w, b))
    return params


def prepare_padded_params(params, weight_dtype=jnp.float32):
    """Zero-pad all feature dims up to multiples of 128 lanes.

    Weights may be cast to bf16 (MXU feed); biases always stay f32 so the
    epilogue (bias add + LeakyReLU) runs in f32.
    """
    padded = []
    for w, b in params:
        d_in, d_out = w.shape
        d_in_p, d_out_p = _round_up(d_in, 128), _round_up(d_out, 128)
        w_p = jnp.zeros((d_in_p, d_out_p), weight_dtype)
        w_p = w_p.at[:d_in, :d_out].set(w.astype(weight_dtype))
        b_p = jnp.zeros((1, d_out_p), jnp.float32)
        b_p = b_p.at[:, :d_out].set(b.astype(jnp.float32))
        padded.append((w_p, b_p))
    return padded


def vec_decoder_forward(z, padded_params, out_dim, negative_slope=0.01,
                        batch_tile=256):
    """z (B, input_dim) -> y (B, out_dim); whole MLP in one pallas_call."""
    assert 0.0 <= negative_slope <= 1.0, "LeakyReLU-as-max requires slope in [0,1]"
    batch, d_in = z.shape
    num_layers = len(padded_params)
    d_in_pad = padded_params[0][0].shape[0]
    d_out_pad = padded_params[-1][0].shape[1]

    # Batch tile: multiple of 8 sublanes, capped by batch_tile.
    bm = min(batch_tile, _round_up(batch, 8))
    batch_pad = _round_up(batch, bm)
    z_pad = jnp.zeros((batch_pad, d_in_pad), z.dtype).at[:batch, :d_in].set(z)

    flat_params = [a for wb in padded_params for a in wb]

    in_specs = [pl.BlockSpec((bm, d_in_pad), lambda m: (m, 0))]
    for w_p, b_p in padded_params:
        in_specs.append(pl.BlockSpec(w_p.shape, lambda m: (0, 0)))  # resident
        in_specs.append(pl.BlockSpec(b_p.shape, lambda m: (0, 0)))  # resident
    out_specs = pl.BlockSpec((bm, d_out_pad), lambda m: (m, 0))

    param_bytes = sum(int(a.size) * a.dtype.itemsize for a in flat_params)
    io_bytes = (z_pad.size * z_pad.dtype.itemsize
                + batch_pad * d_out_pad * z.dtype.itemsize)
    flops = 2 * batch_pad * sum(int(w.shape[0]) * int(w.shape[1])
                                for w, _ in padded_params)

    kernel = functools.partial(_fused_mlp_kernel, num_layers=num_layers,
                               negative_slope=negative_slope)
    y_pad = pl.pallas_call(
        kernel,
        out_shape=jax.ShapeDtypeStruct((batch_pad, d_out_pad), z.dtype),
        grid=(batch_pad // bm,),
        in_specs=in_specs,
        out_specs=out_specs,
        compiler_params=pltpu.CompilerParams(
            dimension_semantics=("parallel",)),
        cost_estimate=pl.CostEstimate(flops=flops, transcendentals=0,
                                      bytes_accessed=param_bytes + io_bytes),
    )(z_pad, *flat_params)
    return y_pad[:batch, :out_dim]


def _reference_forward(z, params, negative_slope=0.01):
    h = z
    for i, (w, b) in enumerate(params):
        h = h @ w + b
        if i != len(params) - 1:
            h = jnp.where(h >= 0.0, h, negative_slope * h)
    return h


if __name__ == "__main__":
    # Small shapes consistent with the module: z_dim=32, nfs=[64, 48], out_dim=16.
    batch, input_dim, nfs, out_dim = 8, 32, [64, 48], 16

    key = jax.random.PRNGKey(0)
    key, kz = jax.random.split(key)
    z = jax.random.normal(kz, (batch, input_dim), dtype=jnp.float32)
    params = init_vec_decoder_params(key, input_dim, nfs, out_dim)
    y_ref = _reference_forward(z, params)

    # f32 path: exact forward semantics of the PyTorch module.
    padded_f32 = prepare_padded_params(params, weight_dtype=jnp.float32)
    y = jax.block_until_ready(vec_decoder_forward(z, padded_f32, out_dim))
    assert y.shape == (batch, out_dim)
    assert jnp.allclose(y, y_ref, atol=1e-5, rtol=1e-5)

    # bf16 MXU-feed path: half the weight bytes, f32 accumulation/epilogue.
    padded_bf16 = prepare_padded_params(params, weight_dtype=jnp.bfloat16)
    y_bf16 = jax.block_until_ready(vec_decoder_forward(z, padded_bf16, out_dim))
    assert y_bf16.shape == (batch, out_dim)
    assert jnp.allclose(y_bf16, y_ref, atol=5e-2, rtol=5e-2)

    print("KERNEL_OK")
</pallas_src>

<mosaic_0001>
module attributes {stable_mosaic.version = 11 : i64} {
  func.func @_fused_mlp_kernel(%arg0: i32, %arg1: memref<8x128xf32, #tpu.memory_space<vmem>>, %arg2: memref<128x128xf32, #tpu.memory_space<vmem>>, %arg3: memref<1x128xf32, #tpu.memory_space<vmem>>, %arg4: memref<128x128xf32, #tpu.memory_space<vmem>>, %arg5: memref<1x128xf32, #tpu.memory_space<vmem>>, %arg6: memref<128x128xf32, #tpu.memory_space<vmem>>, %arg7: memref<1x128xf32, #tpu.memory_space<vmem>>, %arg8: memref<8x128xf32, #tpu.memory_space<vmem>>) attributes {dimension_semantics = [#tpu.dimension_semantics<parallel>], iteration_bounds = array<i64: 1>, scalar_prefetch = 0 : i64, scratch_operands = 0 : i64, tpu.core_type = #tpu.core_type<tc>, window_params = [{transform_indices = @transform_0, window_bounds = array<i64: 8, 128>}, {pipeline_mode = #tpu.pipeline_mode<synchronous>, transform_indices = @transform_1, window_bounds = array<i64: 128, 128>}, {pipeline_mode = #tpu.pipeline_mode<synchronous>, transform_indices = @transform_2, window_bounds = array<i64: 1, 128>}, {pipeline_mode = #tpu.pipeline_mode<synchronous>, transform_indices = @transform_3, window_bounds = array<i64: 128, 128>}, {pipeline_mode = #tpu.pipeline_mode<synchronous>, transform_indices = @transform_4, window_bounds = array<i64: 1, 128>}, {pipeline_mode = #tpu.pipeline_mode<synchronous>, transform_indices = @transform_5, window_bounds = array<i64: 128, 128>}, {pipeline_mode = #tpu.pipeline_mode<synchronous>, transform_indices = @transform_6, window_bounds = array<i64: 1, 128>}, {transform_indices = @transform_7, window_bounds = array<i64: 8, 128>}]} {
    %c0 = arith.constant 0 : index
    %c0_0 = arith.constant 0 : index
    %0 = vector.load %arg1[%c0, %c0_0] : memref<8x128xf32, #tpu.memory_space<vmem>>, vector<8x128xf32>
    %c0_1 = arith.constant 0 : index
    %c0_2 = arith.constant 0 : index
    %1 = vector.load %arg2[%c0_1, %c0_2] : memref<128x128xf32, #tpu.memory_space<vmem>>, vector<128x128xf32>
    %c0_3 = arith.constant 0 : index
    %c0_4 = arith.constant 0 : index
    %2 = vector.load %arg3[%c0_3, %c0_4] : memref<1x128xf32, #tpu.memory_space<vmem>>, vector<1x128xf32>
    %cst = arith.constant dense<0.000000e+00> : vector<8x128xf32>
    %3 = tpu.matmul %0, %1, %cst {dimension_numbers = #tpu.dot_dimension_numbers<[1], [0], [0], [1], [0, 0, 1, 1], [], []>} : vector<8x128xf32>, vector<128x128xf32>, vector<8x128xf32> -> vector<8x128xf32>
    %4 = vector.broadcast %2 : vector<1x128xf32> to vector<8x128xf32>
    %5 = arith.addf %3, %4 : vector<8x128xf32>
    %cst_5 = arith.constant 0.00999999977 : f32
    %6 = vector.broadcast %cst_5 : f32 to vector<8x128xf32>
    %7 = arith.mulf %6, %5 : vector<8x128xf32>
    %8 = arith.maximumf %5, %7 : vector<8x128xf32>
    %c0_6 = arith.constant 0 : index
    %c0_7 = arith.constant 0 : index
    %9 = vector.load %arg4[%c0_6, %c0_7] : memref<128x128xf32, #tpu.memory_space<vmem>>, vector<128x128xf32>
    %c0_8 = arith.constant 0 : index
    %c0_9 = arith.constant 0 : index
    %10 = vector.load %arg5[%c0_8, %c0_9] : memref<1x128xf32, #tpu.memory_space<vmem>>, vector<1x128xf32>
    %cst_10 = arith.constant dense<0.000000e+00> : vector<8x128xf32>
    %11 = tpu.matmul %8, %9, %cst_10 {dimension_numbers = #tpu.dot_dimension_numbers<[1], [0], [0], [1], [0, 0, 1, 1], [], []>} : vector<8x128xf32>, vector<128x128xf32>, vector<8x128xf32> -> vector<8x128xf32>
    %12 = vector.broadcast %10 : vector<1x128xf32> to vector<8x128xf32>
    %13 = arith.addf %11, %12 : vector<8x128xf32>
    %cst_11 = arith.constant 0.00999999977 : f32
    %14 = vector.broadcast %cst_11 : f32 to vector<8x128xf32>
    %15 = arith.mulf %14, %13 : vector<8x128xf32>
    %16 = arith.maximumf %13, %15 : vector<8x128xf32>
    %c0_12 = arith.constant 0 : index
    %c0_13 = arith.constant 0 : index
    %17 = vector.load %arg6[%c0_12, %c0_13] : memref<128x128xf32, #tpu.memory_space<vmem>>, vector<128x128xf32>
    %c0_14 = arith.constant 0 : index
    %c0_15 = arith.constant 0 : index
    %18 = vector.load %arg7[%c0_14, %c0_15] : memref<1x128xf32, #tpu.memory_space<vmem>>, vector<1x128xf32>
    %cst_16 = arith.constant dense<0.000000e+00> : vector<8x128xf32>
    %19 = tpu.matmul %16, %17, %cst_16 {dimension_numbers = #tpu.dot_dimension_numbers<[1], [0], [0], [1], [0, 0, 1, 1], [], []>} : vector<8x128xf32>, vector<128x128xf32>, vector<8x128xf32> -> vector<8x128xf32>
    %20 = vector.broadcast %18 : vector<1x128xf32> to vector<8x128xf32>
    %21 = arith.addf %19, %20 : vector<8x128xf32>
    %c0_17 = arith.constant 0 : index
    %c0_18 = arith.constant 0 : index
    %22 = vector.load %arg8[%c0_17, %c0_18] : memref<8x128xf32, #tpu.memory_space<vmem>>, vector<8x128xf32>
    tpu.vector_store %arg8[%c0_17, %c0_18], %21 {strides = array<i32>} : memref<8x128xf32, #tpu.memory_space<vmem>>, vector<8x128xf32>,
    return
  }
  func.func @transform_0(%arg0: i32) -> (i32, i32) {
    %c0_i32 = arith.constant 0 : i32
    %c0_i32_0 = arith.constant 0 : i32
    return %arg0, %c0_i32 : i32, i32
  }
  func.func @transform_1(%arg0: i32) -> (i32, i32) {
    %c0_i32 = arith.constant 0 : i32
    %c0_i32_0 = arith.constant 0 : i32
    %c0_i32_1 = arith.constant 0 : i32
    return %c0_i32, %c0_i32_0 : i32, i32
  }
  func.func @transform_2(%arg0: i32) -> (i32, i32) {
    %c0_i32 = arith.constant 0 : i32
    %c0_i32_0 = arith.constant 0 : i32
    %c0_i32_1 = arith.constant 0 : i32
    return %c0_i32, %c0_i32_0 : i32, i32
  }
  func.func @transform_3(%arg0: i32) -> (i32, i32) {
    %c0_i32 = arith.constant 0 : i32
    %c0_i32_0 = arith.constant 0 : i32
    %c0_i32_1 = arith.constant 0 : i32
    return %c0_i32, %c0_i32_0 : i32, i32
  }
  func.func @transform_4(%arg0: i32) -> (i32, i32) {
    %c0_i32 = arith.constant 0 : i32
    %c0_i32_0 = arith.constant 0 : i32
    %c0_i32_1 = arith.constant 0 : i32
    return %c0_i32, %c0_i32_0 : i32, i32
  }
  func.func @transform_5(%arg0: i32) -> (i32, i32) {
    %c0_i32 = arith.constant 0 : i32
    %c0_i32_0 = arith.constant 0 : i32
    %c0_i32_1 = arith.constant 0 : i32
    return %c0_i32, %c0_i32_0 : i32, i32
  }
  func.func @transform_6(%arg0: i32) -> (i32, i32) {
    %c0_i32 = arith.constant 0 : i32
    %c0_i32_0 = arith.constant 0 : i32
    %c0_i32_1 = arith.constant 0 : i32
    return %c0_i32, %c0_i32_0 : i32, i32
  }
  func.func @transform_7(%arg0: i32) -> (i32, i32) {
    %c0_i32 = arith.constant 0 : i32
    %c0_i32_0 = arith.constant 0 : i32
    return %arg0, %c0_i32 : i32, i32
  }
}

</mosaic_0001>

<bundles_post_ra>
// kernel: tpu_custom_call.1
= control target key start
LH: loop header
LB: loop body
LE: loop exit
PB: predicated region body
PF: predicated region fallthrough
CT: control target
= control target key end

     0   :  { %12 = vsyncpa [#allocation3], 0  ;;  %s899_s0 = inlined_call_operand.hbm [shape: f32[8,128], index: 0, kind: input, shape index: {}]   ;;  %s900_s1 = inlined_call_operand.hbm [shape: f32[128,128], index: 1, kind: input, shape index: {}]   ;;  %s901_s2 = inlined_call_operand.vmem [shape: f32[1,128], index: 2, kind: input, shape index: {}]   ;;  %s902_s3 = inlined_call_operand.hbm [shape: f32[128,128], index: 3, kind: input, shape index: {}]   ;;  %s903_s4 = inlined_call_operand.vmem [shape: f32[1,128], index: 4, kind: input, shape index: {}]   ;;  %s904_s5 = inlined_call_operand.hbm [shape: f32[128,128], index: 5, kind: input, shape index: {}]   ;;  %s905_s6 = inlined_call_operand.vmem [shape: f32[1,128], index: 6, kind: input, shape index: {}]   ;;  %s906_s7 = inlined_call_operand.hbm [shape: f32[8,128], index: 7, kind: output, shape index: {}]  }
   0x1   :  { %13 = vsyncpa [#allocation6], 0 }
   0x2   :  { %14 = vsyncpa [#allocation9], 0 }
   0x3   :  { %15 = vsyncpa [#allocation4], 0  ;;  %s741_s24 = smov [#allocation5]   ;;  %s623_s28 = scalar_lea.hbm %s900_s1, 2048 }
   0x4   :  { %s31_s25 = sshll.u32 %s741_s24, 4  ;;  %p624_p0 = scmp.ne.s32.totalorder %s900_s1, %s623_s28  ;;  %s32_s25 = int_to_ptr.vmem [resolvable:$true] %s31_s25 }
   0x5   :  { %p627_p1 = scmp.lt.u32.totalorder %s623_s28, %s900_s1 }
   0x7   :  { %p629_p2 = pnand %p627_p1, %p624_p0 }
   0x9   :  { %632 = shalt.err (!%p629_p2)
}
   0xa   :  { %s633_s10 = scalar_lea.vmem %s32_s25, 2048  ;;  %p638_p4 = scmp.lt.s32.totalorder %s32_s25, %s32_s25 }
   0xb   :  { %p634_p3 = scmp.ne.s32.totalorder %s32_s25, %s633_s10  ;;  %p639_p5 = scmp.lt.s32.totalorder %s633_s10, %s633_s10 }
   0xd   :  { %p640_p6 = por %p639_p5, %p638_p4 }
   0xf   :  { %p641_p7 = pnand %p640_p6, %p634_p3 }
  0x11   :  { %644 = shalt.err (!%p641_p7)
}
  0x12   :  { %s742_s11 = smov 128   ;;  %s743_s12 = smov 8  }
  0x13   :  { %37 = dma.hbm_to_vmem [thread:$0]  %s900_s1, 2048, %s32_s25, [#allocation6], %s742_s11, %s742_s11, %s743_s12  }
  0x14   :  { %s744_s15 = smov [#allocation2]   ;;  %s745_s17 = smov [#allocation7]  }
  0x15   :  { %s22_s16 = sshll.u32 %s744_s15, 4  ;;  %s45_s18 = sshll.u32 %s745_s17, 4  ;;  %s23_s16 = int_to_ptr.vmem [resolvable:$true] %s22_s16  ;;  %s46_s18 = int_to_ptr.vmem [resolvable:$true] %s45_s18 }
  0x16   :  { %s645_s21 = scalar_lea.hbm %s899_s0, 128 }
  0x17   :  { %p646_p8 = scmp.ne.s32.totalorder %s899_s0, %s645_s21  ;;  %p649_p9 = scmp.lt.u32.totalorder %s645_s21, %s899_s0 }
  0x19   :  { %p651_p10 = pnand %p649_p9, %p646_p8 }
  0x1b   :  { %654 = shalt.err (!%p651_p10)
}
  0x1c   :  { %s655_s1 = scalar_lea.vmem %s23_s16, 128  ;;  %p660_p12 = scmp.lt.s32.totalorder %s23_s16, %s23_s16 }
  0x1d   :  { %p656_p11 = scmp.ne.s32.totalorder %s23_s16, %s655_s1  ;;  %p661_p13 = scmp.lt.s32.totalorder %s655_s1, %s655_s1 }
  0x1f   :  { %p662_p0 = por %p661_p13, %p660_p12 }
  0x21   :  { %p663_p1 = pnand %p662_p0, %p656_p11 }
  0x23   :  { %666 = shalt.err (!%p663_p1)
}
  0x24   :  { %25 = dma.hbm_to_vmem [thread:$0]  %s899_s0, 128, %s23_s16, [#allocation3]  }
  0x25   :  { %s667_s30 = scalar_lea.hbm %s902_s3, 2048 }
  0x26   :  { %p668_p2 = scmp.ne.s32.totalorder %s902_s3, %s667_s30  ;;  %p671_p3 = scmp.lt.u32.totalorder %s667_s30, %s902_s3 }
  0x28   :  { %p673_p4 = pnand %p671_p3, %p668_p2 }
  0x2a   :  { %676 = shalt.err (!%p673_p4)
}
  0x2b   :  { %s677_s14 = scalar_lea.vmem %s46_s18, 2048  ;;  %p682_p6 = scmp.lt.s32.totalorder %s46_s18, %s46_s18 }
  0x2c   :  { %p678_p5 = scmp.ne.s32.totalorder %s46_s18, %s677_s14  ;;  %p683_p7 = scmp.lt.s32.totalorder %s677_s14, %s677_s14 }
  0x2e   :  { %p684_p8 = por %p683_p7, %p682_p6 }
  0x30   :  { %p685_p9 = pnand %p684_p8, %p678_p5 }
  0x32   :  { %688 = shalt.err (!%p685_p9)
}
  0x33   :  { %51 = dma.hbm_to_vmem [thread:$0]  %s902_s3, 2048, %s46_s18, [#allocation6], %s742_s11, %s742_s11, %s743_s12  }
  0x34   :  { %s746_s16 = smov [#allocation8]   ;;  %s689_s21 = scalar_lea.hbm %s904_s5, 2048 }
  0x35   :  { %s59_s17 = sshll.u32 %s746_s16, 4  ;;  %p690_p10 = scmp.ne.s32.totalorder %s904_s5, %s689_s21  ;;  %s60_s17 = int_to_ptr.vmem [resolvable:$true] %s59_s17 }
  0x36   :  { %p693_p11 = scmp.lt.u32.totalorder %s689_s21, %s904_s5 }
  0x38   :  { %p695_p12 = pnand %p693_p11, %p690_p10 }
  0x3a   :  { %698 = shalt.err (!%p695_p12)
}
  0x3b   :  { %s699_s1 = scalar_lea.vmem %s60_s17, 2048  ;;  %p704_p0 = scmp.lt.s32.totalorder %s60_s17, %s60_s17 }
  0x3c   :  { %p700_p13 = scmp.ne.s32.totalorder %s60_s17, %s699_s1  ;;  %p705_p1 = scmp.lt.s32.totalorder %s699_s1, %s699_s1 }
  0x3e   :  { %p706_p2 = por %p705_p1, %p704_p0 }
  0x40   :  { %p707_p3 = pnand %p706_p2, %p700_p13 }
  0x42   :  { %710 = shalt.err (!%p707_p3)
}
  0x43   :  { %65 = dma.hbm_to_vmem [thread:$0]  %s904_s5, 2048, %s60_s17, [#allocation9], %s742_s11, %s742_s11, %s743_s12  }
  0x44   :  { %733 = dma.done.wait [#allocation3], 128  }
  0x45   :  { %734 = vsyncadd [#allocation3], 4294967168 }
  0x46   :  { %735 = dma.done.wait [#allocation6], 4096  }
  0x47   :  { %736 = vsyncadd [#allocation6], 4294963200 }
  0x48   :  { %737 = dma.done.wait [#allocation9], 2048  }
  0x49   :  { %738 = vsyncadd [#allocation9], 4294965248  ;;  %v747_v0 = vmov 0.0|0.0   ;;  %vm748_vm0 = vmmov 0   ;;  %v749_v1 = vmov 0.0   ;;  %v81_v2 = vld [vmem:[#allocation5] sm:$0xff] }
  0x4a   :  { %541 = vmatprep.subr.bf16.mxu0 %v747_v0  ;;  %468 = vmatprep.mubr.msk.f32.mxu0 %vm748_vm0, %v749_v1  ;;  %v82_v3 = vld [vmem:[#allocation5 + $0x8] sm:$0xff]  ;;  %v83_v4 = vld [vmem:[#allocation5 + $0x10] sm:$0xff]  ;;  %v84_v6 = vld [vmem:[#allocation5 + $0x18] sm:$0xff]  ;;  %s750_s28 = smov [#allocation10]  }
  0x4b   :  { %565 = vmatprep.subr.bf16.mxu1 %v747_v0  ;;  %503 = vmatprep.mubr.msk.f32.mxu1 %vm748_vm0, %v749_v1  ;;  %v542_v5 = vpack.c.bf16 %v82_v3, %v81_v2  ;;  %v545_v7 = vpack.c.bf16 %v84_v6, %v83_v4  ;;  %v85_v8 = vld [vmem:[#allocation5 + $0x20] sm:$0xff]  ;;  %v86_v9 = vld [vmem:[#allocation5 + $0x28] sm:$0xff]  ;;  %v178_v12 = vld [vmem:[#allocation7 + $0x10] sm:$0xff]  ;;  %s371_s29 = sshll.u32 %s750_s28, 4  ;;  %s372_s29 = int_to_ptr.vmem [resolvable:$true] %s371_s29 }
  0x4c   :  { %v176_v10 = vld [vmem:[#allocation7] sm:$0xff]  ;;  %v177_v11 = vld [vmem:[#allocation7 + $0x8] sm:$0xff]  ;;  %v179_v13 = vld [vmem:[#allocation7 + $0x18] sm:$0xff]  ;;  %v548_v14 = vpack.c.bf16 %v86_v9, %v85_v8  ;;  %s711_s30 = scalar_lea.vmem %s372_s29, 128  ;;  %p716_p5 = scmp.lt.s32.totalorder %s372_s29, %s372_s29 }
  0x4d   :  { %543 = vmatpush3.bf16.msra.mxu0 %v542_v5  ;;  %v566_v15 = vpack.c.bf16 %v177_v11, %v176_v10  ;;  %v87_v16 = vld [vmem:[#allocation5 + $0x30] sm:$0xff]  ;;  %v88_v17 = vld [vmem:[#allocation5 + $0x38] sm:$0xff]  ;;  %v569_v18 = vpack.c.bf16 %v179_v13, %v178_v12  ;;  %v180_v19 = vld [vmem:[#allocation7 + $0x20] sm:$0xff]  ;;  %p712_p4 = scmp.ne.s32.totalorder %s372_s29, %s711_s30  ;;  %p717_p6 = scmp.lt.s32.totalorder %s711_s30, %s711_s30 }
  0x4e   :  { %544 = vmatprep.subr.bf16.mxu0 %v747_v0  ;;  %v181_v20 = vld [vmem:[#allocation7 + $0x28] sm:$0xff]  ;;  %v551_v21 = vpack.c.bf16 %v88_v17, %v87_v16  ;;  %v89_v22 = vld [vmem:[#allocation5 + $0x40] sm:$0xff]  ;;  %v182_v25 = vld [vmem:[#allocation7 + $0x30] sm:$0xff] }
  0x4f   :  { %567 = vmatpush3.bf16.msra.mxu1 %v566_v15  ;;  %v90_v23 = vld [vmem:[#allocation5 + $0x48] sm:$0xff]  ;;  %v572_v24 = vpack.c.bf16 %v181_v20, %v180_v19  ;;  %v183_v26 = vld [vmem:[#allocation7 + $0x38] sm:$0xff]  ;;  %v91_v28 = vld [vmem:[#allocation5 + $0x50] sm:$0xff]  ;;  %p718_p7 = por %p717_p6, %p716_p5 }
  0x50   :  { %568 = vmatprep.subr.bf16.mxu1 %v747_v0  ;;  %v554_v27 = vpack.c.bf16 %v90_v23, %v89_v22  ;;  %v92_v29 = vld [vmem:[#allocation5 + $0x58] sm:$0xff]  ;;  %v575_v30 = vpack.c.bf16 %v183_v26, %v182_v25  ;;  %v184_v31 = vld [vmem:[#allocation7 + $0x40] sm:$0xff]  ;;  %v185_v32 = vld [vmem:[#allocation7 + $0x48] sm:$0xff] }
  0x51   :  { %546 = vmatpush3.bf16.msra.mxu0 %v545_v7  ;;  %v557_v33 = vpack.c.bf16 %v92_v29, %v91_v28  ;;  %v93_v34 = vld [vmem:[#allocation5 + $0x60] sm:$0xff]  ;;  %v94_v35 = vld [vmem:[#allocation5 + $0x68] sm:$0xff]  ;;  %v578_v36 = vpack.c.bf16 %v185_v32, %v184_v31  ;;  %v186_v37 = vld [vmem:[#allocation7 + $0x50] sm:$0xff]  ;;  %p719_p8 = pnand %p718_p7, %p712_p4 }
  0x52   :  { %547 = vmatprep.subr.bf16.mxu0 %v747_v0  ;;  %v187_v38 = vld [vmem:[#allocation7 + $0x58] sm:$0xff]  ;;  %v560_v39 = vpack.c.bf16 %v94_v35, %v93_v34  ;;  %v95_v40 = vld [vmem:[#allocation5 + $0x70] sm:$0xff]  ;;  %v188_v45 = vld [vmem:[#allocation7 + $0x60] sm:$0xff] }
  0x53   :  { %570 = vmatpush3.bf16.msra.mxu1 %v569_v18  ;;  %v96_v41 = vld [vmem:[#allocation5 + $0x78] sm:$0xff]  ;;  %v581_v42 = vpack.c.bf16 %v187_v38, %v186_v37  ;;  %v189_v46 = vld [vmem:[#allocation7 + $0x68] sm:$0xff]  ;;  %v190_v48 = vld [vmem:[#allocation7 + $0x70] sm:$0xff] }
  0x54   :  { %571 = vmatprep.subr.bf16.mxu1 %v747_v0  ;;  %v563_v43 = vpack.c.bf16 %v96_v41, %v95_v40  ;;  %v80_v44 = vld [vmem:[#allocation2] sm:$0xff]  ;;  %v584_v47 = vpack.c.bf16 %v189_v46, %v188_v45  ;;  %v271_v51 = vld [vmem:[#allocation8] sm:$0xff]  ;;  %v272_v52 = vld [vmem:[#allocation8 + $0x8] sm:$0xff] }
  0x55   :  { %549 = vmatpush3.bf16.msra.mxu0 %v548_v14  ;;  %v191_v49 = vld [vmem:[#allocation7 + $0x78] sm:$0xff]  ;;  %v273_v53 = vld [vmem:[#allocation8 + $0x10] sm:$0xff]  ;;  %v590_v54 = vpack.c.bf16 %v272_v52, %v271_v51  ;;  %v275_v57 = vld [vmem:[#allocation8 + $0x20] sm:$0xff] }
  0x56   :  { %550 = vmatprep.subr.bf16.mxu0 %v747_v0  ;;  %v587_v50 = vpack.c.bf16 %v191_v49, %v190_v48  ;;  %v274_v55 = vld [vmem:[#allocation8 + $0x18] sm:$0xff]  ;;  %v276_v58 = vld [vmem:[#allocation8 + $0x28] sm:$0xff]  ;;  %v277_v60 = vld [vmem:[#allocation8 + $0x30] sm:$0xff] }
  0x57   :  { %573 = vmatpush3.bf16.msra.mxu1 %v572_v24  ;;  %v593_v56 = vpack.c.bf16 %v274_v55, %v273_v53  ;;  %v596_v59 = vpack.c.bf16 %v276_v58, %v275_v57  ;;  %v278_v61 = vld [vmem:[#allocation8 + $0x38] sm:$0xff]  ;;  %v279_v63 = vld [vmem:[#allocation8 + $0x40] sm:$0xff]  ;;  %v281_v3 = vld [vmem:[#allocation8 + $0x50] sm:$0xff] }
  0x58   :  { %574 = vmatprep.subr.bf16.mxu1 %v747_v0  ;;  %v599_v62 = vpack.c.bf16 %v278_v61, %v277_v60  ;;  %v282_v4 = vld [vmem:[#allocation8 + $0x58] sm:$0xff]  ;;  %v283_v12 = vld [vmem:[#allocation8 + $0x60] sm:$0xff]  ;;  %v284_v13 = vld [vmem:[#allocation8 + $0x68] sm:$0xff] }
  0x59   :  { %552 = vmatpush3.bf16.msra.mxu0 %v551_v21  ;;  %v605_v5 = vpack.c.bf16 %v282_v4, %v281_v3  ;;  %v382_v6 = vld [vmem:[%s901_s2] ss:$0 sm:$0xff]  ;;  %v608_v14 = vpack.c.bf16 %v284_v13, %v283_v12  ;;  %v285_v15 = vld [vmem:[#allocation8 + $0x70] sm:$0xff] }
  0x5a   :  { %553 = vmatprep.subr.bf16.mxu0 %v747_v0  ;;  %v286_v16 = vld [vmem:[#allocation8 + $0x78] sm:$0xff] }
  0x5b   :  { %576 = vmatpush3.bf16.msra.mxu1 %v575_v30  ;;  %v611_v17 = vpack.c.bf16 %v286_v16, %v285_v15  ;;  %v383_v18 = vld [vmem:[%s903_s4] ss:$0 sm:$0xff] }
  0x5c   :  { %577 = vmatprep.subr.bf16.mxu1 %v747_v0  ;;  %v384_v24 = vld [vmem:[%s905_s6] ss:$0 sm:$0xff] }
  0x5d   :  { %555 = vmatpush3.bf16.msra.mxu0 %v554_v27 }
  0x5e   :  { %556 = vmatprep.subr.bf16.mxu0 %v747_v0 }
  0x5f   :  { %579 = vmatpush3.bf16.msra.mxu1 %v578_v36 }
  0x60   :  { %580 = vmatprep.subr.bf16.mxu1 %v747_v0 }
  0x61   :  { %558 = vmatpush3.bf16.msra.mxu0 %v557_v33 }
  0x62   :  { %559 = vmatprep.subr.bf16.mxu0 %v747_v0 }
  0x63   :  { %582 = vmatpush3.bf16.msra.mxu1 %v581_v42 }
  0x64   :  { %583 = vmatprep.subr.bf16.mxu1 %v747_v0 }
  0x65   :  { %561 = vmatpush3.bf16.msra.mxu0 %v560_v39 }
  0x66   :  { %562 = vmatprep.subr.bf16.mxu0 %v747_v0 }
  0x67   :  { %585 = vmatpush3.bf16.msra.mxu1 %v584_v47 }
  0x68   :  { %586 = vmatprep.subr.bf16.mxu1 %v747_v0 }
  0x69   :  { %564 = vmatpush3.bf16.msra.mxu0 %v563_v43 }
  0x6a   :  { %589 = vmatprep.subr.bf16.mxu0 %v747_v0 }
  0x6b   :  { %588 = vmatpush3.bf16.msra.mxu1 %v587_v50 }
  0x6c   :  { %469 = vmatmul.mubr.f32.vlgmr.msra.gmra.mrb[0].mxu0 %v80_v44 }
  0x6d   :  { %538 = vmatprep.mubr.msk.f32.mxu0 %vm748_vm0, %v749_v1  ;;  %591 = vmatpush3.bf16.msra.mxu0 %v590_v54  ;;  %v280_v1 = vld [vmem:[#allocation8 + $0x48] sm:$0xff] }
  0x6e   :  { %592 = vmatprep.subr.bf16.mxu0 %v747_v0  ;;  %v602_v2 = vpack.c.bf16 %v280_v1, %v279_v63 }
  0x71   :  { %594 = vmatpush3.bf16.msra.mxu0 %v593_v56 }
  0x72   :  { %595 = vmatprep.subr.bf16.mxu0 %v747_v0 }
  0x75   :  { %597 = vmatpush3.bf16.msra.mxu0 %v596_v59 }
  0x76   :  { %598 = vmatprep.subr.bf16.mxu0 %v747_v0 }
  0x79   :  { %600 = vmatpush3.bf16.msra.mxu0 %v599_v62 }
  0x7a   :  { %601 = vmatprep.subr.bf16.mxu0 %v747_v0 }
  0x7d   :  { %603 = vmatpush3.bf16.msra.mxu0 %v602_v2 }
  0x7e   :  { %604 = vmatprep.subr.bf16.mxu0 %v747_v0 }
  0x81   :  { %606 = vmatpush3.bf16.msra.mxu0 %v605_v5 }
  0x82   :  { %607 = vmatprep.subr.bf16.mxu0 %v747_v0 }
  0x85   :  { %609 = vmatpush3.bf16.msra.mxu0 %v608_v14 }
  0x86   :  { %610 = vmatprep.subr.bf16.mxu0 %v747_v0 }
  0x89   :  { %612 = vmatpush3.bf16.msra.mxu0 %v611_v17 }
 0x13f   :  { %v170_v7 = vpop.f32.mrb[0].mxu0 }
 0x140   :  { %v171_v8 = vadd.f32 %v382_v6, %v170_v7  ;;  %v470_v9 = vpop.f32.mrb[1].mxu0 }
 0x142   :  { %v174_v10 = vmul.f32 0.01, %v171_v8 }
 0x144   :  { %v175_v11 = vmax.f32 %v171_v8, %v174_v10 }
 0x146   :  { %504 = vmatmul.mubr.f32.vlgmr.msra.gmra.mrb[0].mxu1 %v175_v11 }
 0x219   :  { %v265_v19 = vpop.f32.mrb[0].mxu1 }
 0x21a   :  { %v266_v20 = vadd.f32 %v383_v18, %v265_v19  ;;  %v505_v21 = vpop.f32.mrb[1].mxu1 }
 0x21c   :  { %v269_v22 = vmul.f32 0.01, %v266_v20 }
 0x21e   :  { %v270_v23 = vmax.f32 %v266_v20, %v269_v22 }
 0x220   :  { %539 = vmatmul.mubr.f32.vlgmr.msra.gmra.mrb[2].mxu0 %v270_v23 }
 0x2f3   :  { %v360_v0 = vpop.f32.mrb[2].mxu0 }
 0x2f4   :  { %v361_v25 = vadd.f32 %v384_v24, %v360_v0  ;;  %v540_v26 = vpop.f32.mrb[3].mxu0 }
 0x2f6   :  { %364 = vst [vmem:[#allocation10] sm:$0xff] %v361_v25 }
 0x2f7   :  { %722 = shalt.err (!%p719_p8)
}
 0x2f8   :  { %s723_s9 = scalar_lea.hbm %s906_s7, 128 }
 0x2f9   :  { %p724_p9 = scmp.ne.s32.totalorder %s906_s7, %s723_s9  ;;  %p727_p10 = scmp.lt.u32.totalorder %s723_s9, %s906_s7 }
 0x2fb   :  { %p729_p11 = pnand %p727_p10, %p724_p9 }
 0x2fd   :  { %732 = shalt.err (!%p729_p11)
}
 0x2fe   :  { %374 = dma.vmem_to_hbm [thread:$0]  %s372_s29, 128, %s906_s7, [#allocation4]  }
 0x2ff   :  { %739 = dma.done.wait [#allocation4], 128  }
 0x300   :  { %740 = vsyncadd [#allocation4], 4294967168 }
 0x301   :  { %378 = vsyncpa [#allocation3], 1 }
 0x302   :  { %379 = vsyncpa [#allocation6], 1 }
 0x303   :  { %380 = vsyncpa [#allocation9], 1 }
 0x304   :  { %381 = vsyncpa [#allocation4], 1 }

</bundles_post_ra>
